<compile_context>
chip_gen: v5e
topology: v5e:2x2
jax: 0.10.0
libtpu: 0.0.40
codegen_flags: <defaults>
</compile_context>

<pallas_src>
import functools

import jax
import jax.numpy as jnp
from jax.experimental import pallas as pl
from jax.experimental.pallas import tpu as pltpu


def _encoder_kernel(x_ref, w_ref, b_ref, o_ref):
    # x_ref: (tm, din), w_ref: (din, hidden), b_ref: (1, hidden), o_ref: (tm, hidden)
    y = jnp.dot(x_ref[...], w_ref[...], preferred_element_type=jnp.float32)
    y = y + b_ref[...].astype(jnp.float32)          # broadcast bias over rows
    o_ref[...] = jnp.maximum(y, 0.0).astype(o_ref.dtype)


def _round_up(x, m):
    return ((x + m - 1) // m) * m


def _choose_row_tile(M, tm_max):
    """Sublane-aligned (multiple of 8) row tile giving a balanced, even grid.

    - At least 2 row tiles (when M > 8) so both v7x TensorCores get work.
    - Even tile count so the 2-TC split is balanced (no solitary ragged tile).
    - ceil(M / tm_max) tiles for large M, amortizing per-step overhead.
    """
    tm_max = max(8, _round_up(tm_max, 8))
    n_tiles = max(2, pl.cdiv(M, tm_max))
    n_tiles += n_tiles % 2                      # even count -> balanced across 2 TCs
    return max(8, _round_up(pl.cdiv(M, n_tiles), 8))


@functools.partial(jax.jit, static_argnames=("tm_max",))
def _encoder_forward_2d(x, w, b, *, tm_max=8192):
    """relu(x @ w + b) via a Pallas TPU kernel.

    x: (M, din); w: (din, hidden) (transposed PyTorch weight); b: (hidden,)
    Output dtype follows x.dtype; accumulation is always f32 on the MXU.
    """
    M, din = x.shape
    hidden = w.shape[1]

    tm = _choose_row_tile(M, tm_max)
    grid_m = pl.cdiv(M, tm)          # ragged last tile handled (masked) by Pallas

    b2 = b.reshape(1, hidden)

    x_isz = jnp.dtype(x.dtype).itemsize
    w_isz = jnp.dtype(w.dtype).itemsize
    b_isz = jnp.dtype(b.dtype).itemsize
    out_isz = x_isz                               # output inherits x's dtype

    # Working set: double-buffered x tile + double-buffered out tile + resident
    # W + bias, plus ~2 MiB slack. Set explicitly so tile sweeps don't trip
    # v5e's 16 MiB scoped-VMEM default; cap at 48 MiB (fits v7x's 64 MiB VMEM).
    needed = (2 * tm * din * x_isz + 2 * tm * hidden * out_isz
              + din * hidden * w_isz + hidden * b_isz)
    vmem_limit = int(min(max(needed + (2 << 20), 16 << 20), 48 << 20))

    cost = pl.CostEstimate(
        flops=2 * M * din * hidden + 2 * M * hidden,        # matmul + bias + relu
        transcendentals=0,
        bytes_accessed=(M * din * x_isz + din * hidden * w_isz
                        + hidden * b_isz + M * hidden * out_isz),
    )

    out = pl.pallas_call(
        _encoder_kernel,
        out_shape=jax.ShapeDtypeStruct((M, hidden), x.dtype),
        grid_spec=pltpu.PrefetchScalarGridSpec(
            num_scalar_prefetch=0,
            grid=(grid_m,),
            in_specs=[
                pl.BlockSpec((tm, din), lambda i: (i, 0)),
                pl.BlockSpec((din, hidden), lambda i: (0, 0)),   # whole W resident
                pl.BlockSpec((1, hidden), lambda i: (0, 0)),     # bias resident
            ],
            out_specs=pl.BlockSpec((tm, hidden), lambda i: (i, 0)),
        ),
        compiler_params=pltpu.CompilerParams(
            dimension_semantics=("parallel",),
            vmem_limit_bytes=vmem_limit,
        ),
        cost_estimate=cost,
    )(x, w, b2)
    return out


def encoder_forward(x, w, b, *, tm_max=8192):
    """Apply the encoder over arbitrary leading dims (Linear acts on last dim)."""
    din = x.shape[-1]
    hidden = w.shape[1]
    lead = x.shape[:-1]
    x2 = x.reshape(-1, din)
    out2 = _encoder_forward_2d(x2, w, b, tm_max=tm_max)
    return out2.reshape(*lead, hidden)


def init_encoder_params(key, din=32, hidden_dim=128):
    """Deterministic init mirroring nn.Linear's U(-1/sqrt(din), 1/sqrt(din))."""
    kw, kb = jax.random.split(key)
    bound = 1.0 / jnp.sqrt(jnp.float32(din))
    # Stored as (din, hidden) so the kernel computes x @ w directly.
    w = jax.random.uniform(kw, (din, hidden_dim), jnp.float32, -bound, bound)
    b = jax.random.uniform(kb, (hidden_dim,), jnp.float32, -bound, bound)
    return w, b


if __name__ == "__main__":
    key = jax.random.PRNGKey(0)
    k_x, k_p, k_big = jax.random.split(key, 3)

    din, hidden_dim = 32, 128
    batch, n_agents = 2, 4   # Encoder in DGN is applied to (batch, n_agents, din)

    x = jax.random.normal(k_x, (batch, n_agents, din), jnp.float32)
    w, b = init_encoder_params(k_p, din, hidden_dim)

    # Small DGN-shaped call (single tile path).
    out = encoder_forward(x, w, b)
    jax.block_until_ready(out)
    ref = jnp.maximum(x @ w + b, 0.0)
    assert out.shape == (batch, n_agents, hidden_dim)
    assert jnp.allclose(out, ref, atol=1e-5, rtol=1e-5)

    # Larger ragged shape: exercises the multi-step, balanced (even) grid and
    # the masked last row-tile.
    x_big = jax.random.normal(k_big, (300, din), jnp.float32)
    out_big = encoder_forward(x_big, w, b)
    jax.block_until_ready(out_big)
    ref_big = jnp.maximum(x_big @ w + b, 0.0)
    assert jnp.allclose(out_big, ref_big, atol=1e-5, rtol=1e-5)

    # bf16 I/O path (halves the dominant output writeback); loose sanity check.
    x_bf = x_big.astype(jnp.bfloat16)
    out_bf = encoder_forward(x_bf, w.astype(jnp.bfloat16), b)
    jax.block_until_ready(out_bf)
    assert out_bf.dtype == jnp.bfloat16
    assert bool(jnp.all(jnp.isfinite(out_bf.astype(jnp.float32))))

    print("KERNEL_OK")
</pallas_src>

<mosaic_0001>
module attributes {stable_mosaic.version = 11 : i64} {
  func.func @_encoder_kernel(%arg0: i32, %arg1: memref<8x32xf32, #tpu.memory_space<vmem>>, %arg2: memref<32x128xf32, #tpu.memory_space<vmem>>, %arg3: memref<1x128xf32, #tpu.memory_space<vmem>>, %arg4: memref<8x128xf32, #tpu.memory_space<vmem>>) attributes {dimension_semantics = [#tpu.dimension_semantics<parallel>], iteration_bounds = array<i64: 1>, scalar_prefetch = 0 : i64, scratch_operands = 0 : i64, tpu.core_type = #tpu.core_type<tc>, window_params = [{transform_indices = @transform_0, window_bounds = array<i64: 8, 32>}, {pipeline_mode = #tpu.pipeline_mode<synchronous>, transform_indices = @transform_1, window_bounds = array<i64: 32, 128>}, {pipeline_mode = #tpu.pipeline_mode<synchronous>, transform_indices = @transform_2, window_bounds = array<i64: 1, 128>}, {transform_indices = @transform_3, window_bounds = array<i64: 8, 128>}]} {
    %c0 = arith.constant 0 : index
    %c0_0 = arith.constant 0 : index
    %0 = vector.load %arg1[%c0, %c0_0] : memref<8x32xf32, #tpu.memory_space<vmem>>, vector<8x32xf32>
    %c0_1 = arith.constant 0 : index
    %c0_2 = arith.constant 0 : index
    %1 = vector.load %arg2[%c0_1, %c0_2] : memref<32x128xf32, #tpu.memory_space<vmem>>, vector<32x128xf32>
    %cst = arith.constant dense<0.000000e+00> : vector<8x128xf32>
    %2 = tpu.matmul %0, %1, %cst {dimension_numbers = #tpu.dot_dimension_numbers<[1], [0], [0], [1], [0, 0, 1, 1], [], []>} : vector<8x32xf32>, vector<32x128xf32>, vector<8x128xf32> -> vector<8x128xf32>
    %c0_3 = arith.constant 0 : index
    %c0_4 = arith.constant 0 : index
    %3 = vector.load %arg3[%c0_3, %c0_4] : memref<1x128xf32, #tpu.memory_space<vmem>>, vector<1x128xf32>
    %4 = vector.broadcast %3 : vector<1x128xf32> to vector<8x128xf32>
    %5 = arith.addf %2, %4 : vector<8x128xf32>
    %cst_5 = arith.constant 0.000000e+00 : f32
    %6 = vector.broadcast %cst_5 : f32 to vector<8x128xf32>
    %7 = arith.maximumf %5, %6 : vector<8x128xf32>
    %c0_6 = arith.constant 0 : index
    %c0_7 = arith.constant 0 : index
    %8 = vector.load %arg4[%c0_6, %c0_7] : memref<8x128xf32, #tpu.memory_space<vmem>>, vector<8x128xf32>
    tpu.vector_store %arg4[%c0_6, %c0_7], %7 {strides = array<i32>} : memref<8x128xf32, #tpu.memory_space<vmem>>, vector<8x128xf32>,
    return
  }
  func.func @transform_0(%arg0: i32) -> (i32, i32) {
    %c0_i32 = arith.constant 0 : i32
    %c0_i32_0 = arith.constant 0 : i32
    return %arg0, %c0_i32 : i32, i32
  }
  func.func @transform_1(%arg0: i32) -> (i32, i32) {
    %c0_i32 = arith.constant 0 : i32
    %c0_i32_0 = arith.constant 0 : i32
    %c0_i32_1 = arith.constant 0 : i32
    return %c0_i32, %c0_i32_0 : i32, i32
  }
  func.func @transform_2(%arg0: i32) -> (i32, i32) {
    %c0_i32 = arith.constant 0 : i32
    %c0_i32_0 = arith.constant 0 : i32
    %c0_i32_1 = arith.constant 0 : i32
    return %c0_i32, %c0_i32_0 : i32, i32
  }
  func.func @transform_3(%arg0: i32) -> (i32, i32) {
    %c0_i32 = arith.constant 0 : i32
    %c0_i32_0 = arith.constant 0 : i32
    return %arg0, %c0_i32 : i32, i32
  }
}

</mosaic_0001>

<bundles_post_ra>
// kernel: _encoder_forward_2d.1
= control target key start
LH: loop header
LB: loop body
LE: loop exit
PB: predicated region body
PF: predicated region fallthrough
CT: control target
= control target key end

     0   :  { %8 = vsyncpa [#allocation3], 0  ;;  %s220_s0 = inlined_call_operand.hbm [shape: f32[8,32], index: 0, kind: input, shape index: {}]   ;;  %s221_s1 = inlined_call_operand.hbm [shape: f32[32,128], index: 1, kind: input, shape index: {}]   ;;  %s222_s2 = inlined_call_operand.vmem [shape: f32[1,128], index: 2, kind: input, shape index: {}]   ;;  %s223_s3 = inlined_call_operand.hbm [shape: f32[8,128], index: 3, kind: output, shape index: {}]  }
   0x1   :  { %9 = vsyncpa [#allocation6], 0 }
   0x2   :  { %10 = vsyncpa [#allocation4], 0  ;;  %s16_s14 = sshll.u32 %s220_s0, 4  ;;  %s183_s15 = smov [#allocation2]   ;;  %s17_s14 = int_to_ptr.hbm [resolvable:$true] %s16_s14 }
   0x3   :  { %s18_s16 = sshll.u32 %s183_s15, 4  ;;  %s26_s19 = sshll.u32 %s221_s1, 4  ;;  %s19_s16 = int_to_ptr.vmem [resolvable:$true] %s18_s16  ;;  %s27_s19 = int_to_ptr.hbm [resolvable:$true] %s26_s19 }
   0x4   :  { %21 = dma.hbm_to_vmem [thread:$0]  %s17_s14, 128, %s19_s16, [#allocation3]  }
   0x5   :  { %s184_s20 = smov [#allocation5]   ;;  %s185_s22 = smov 128  }
   0x6   :  { %s28_s21 = sshll.u32 %s184_s20, 4  ;;  %s186_s23 = smov 8   ;;  %s29_s21 = int_to_ptr.vmem [resolvable:$true] %s28_s21 }
   0x7   :  { %34 = dma.hbm_to_vmem [thread:$0]  %s27_s19, 512, %s29_s21, [#allocation6], %s185_s22, %s185_s22, %s186_s23  }
   0x8   :  { %177 = dma.done.wait [#allocation3], 128  }
   0x9   :  { %178 = vsyncadd [#allocation3], 4294967168 }
   0xa   :  { %179 = dma.done.wait [#allocation6], 512  }
   0xb   :  { %180 = vsyncadd [#allocation6], 4294966784  ;;  %v49_v0 = vld [vmem:[#allocation5 + $0x18] sm:$0xff]  ;;  %v48_v1 = vld [vmem:[#allocation5 + $0x10] sm:$0xff]  ;;  %vm54_vm0 = vcmask 261120   ;;  %s187_s24 = smov [#allocation7]  }
   0xc   :  { %70 = vmatpush.msra.mxu0 %v49_v0  ;;  %v47_v2 = vld [vmem:[#allocation5 + $0x8] sm:$0xff]  ;;  %v46_v3 = vld [vmem:[#allocation5] sm:$0xff]  ;;  %v45_v4 = vld [vmem:[#allocation2] sm:$0xff]  ;;  %s85_s25 = sshll.u32 %s187_s24, 4  ;;  %s87_s28 = sshll.u32 %s223_s3, 4  ;;  %s86_s25 = int_to_ptr.vmem [resolvable:$true] %s85_s25  ;;  %s88_s28 = int_to_ptr.hbm [resolvable:$true] %s87_s28 }
   0xd   :  { %v104_v5 = vld [vmem:[%s222_s2] ss:$0 sm:$0xff] }
   0xe   :  { %71 = vmatpush.msra.mxu0 %v48_v1 }
  0x10   :  { %72 = vmatpush.msra.mxu0 %v47_v2 }
  0x12   :  { %73 = vmatpush.msra.mxu0 %v46_v3 }
  0x13   :  { %98 = vmatmul.msk.f32.vlgmr.msra.gmra.mxu0 %vm54_vm0, %v45_v4 }
  0x90   :  { %v75_v6 = vpop.f32.mrf.mxu0 }
  0x91   :  { %v76_v7 = vadd.f32 %v104_v5, %v75_v6 }
  0x93   :  { %v78_v8 = vmax.f32 %v76_v7, 0.0 }
  0x95   :  { %79 = vst [vmem:[#allocation7] sm:$0xff] %v78_v8 }
  0x96   :  { %90 = dma.vmem_to_hbm [thread:$0]  %s86_s25, 128, %s88_s28, [#allocation4]  }
  0x97   :  { %181 = dma.done.wait [#allocation4], 128  }
  0x98   :  { %182 = vsyncadd [#allocation4], 4294967168 }
  0x99   :  { %95 = vsyncpa [#allocation3], 1 }
  0x9a   :  { %96 = vsyncpa [#allocation6], 1 }
  0x9b   :  { %97 = vsyncpa [#allocation4], 1 }

</bundles_post_ra>
